<compile_context>
chip_gen: v7x
topology: tpu7x:2x2x1
jax: 0.10.0
libtpu: 0.0.40
codegen_flags: <defaults>
</compile_context>

<pallas_src>
import math
import functools

import jax
import jax.numpy as jnp
from jax.experimental import pallas as pl
from jax.experimental.pallas import tpu as pltpu


def _transformer_kernel(x_ref, w_in_ref, b_in_ref, w_out_ref, b_out_ref, o_ref,
                        *, layers, batch, seq, embed_dim):
    B, S, E = batch, seq, embed_dim
    # Flatten batch*seq onto the sublane axis (layout-free: second-minor dims merge,
    # lane dim unchanged). Activation stays resident in VMEM/vregs across all layers.
    x = x_ref[...].reshape(B * S, E)                                      # [B*S, E] f32

    # Statically unrolled layer loop (all layer weights resident: ~0.4 MiB bf16 here).
    # TODO(synk): for realistic L/E, stream weights per-layer via a grid axis over
    #             layers + VMEM activation scratch instead of keeping all resident.
    for l in range(layers):
        # Fused QKV projection: bf16 operands, f32 MXU accumulation (+ f32 bias).
        qkv = jnp.dot(x.astype(jnp.bfloat16), w_in_ref[l],
                      preferred_element_type=jnp.float32) + b_in_ref[l]   # [B*S, 3E]
        q = qkv[:, 0 * E:1 * E].reshape(B, S, E)        # 1/sqrt(E) pre-folded into Wq
        k = qkv[:, 1 * E:2 * E].reshape(B, S, E)
        v = qkv[:, 2 * E:3 * E].reshape(B, S, E)

        # Scores: batched contraction on the feature axis (no k^T materialization).
        s = jax.lax.dot_general(q.astype(jnp.bfloat16), k.astype(jnp.bfloat16),
                                dimension_numbers=(((2,), (2,)), ((0,), (0,))),
                                preferred_element_type=jnp.float32)       # [B, S, S]

        # Softmax over keys — exact divide (avoids approx-recip drift compounding
        # across layers; cost is negligible at S=8).
        # TODO(synk): switch to flash-style KV tiling / online softmax once S is large
        #             enough that the SxS f32 score tile pressures VMEM (v7x: 64 MiB).
        m = jnp.max(s, axis=-1, keepdims=True)
        p = jnp.exp(s - m)
        p = p / jnp.sum(p, axis=-1, keepdims=True)

        attn = jax.lax.dot_general(p.astype(jnp.bfloat16), v.astype(jnp.bfloat16),
                                   dimension_numbers=(((2,), (1,)), ((0,), (0,))),
                                   preferred_element_type=jnp.float32)    # [B, S, E]

        # Output projection (weights pre-transposed to [in, out]).
        x = jnp.dot(attn.reshape(B * S, E).astype(jnp.bfloat16), w_out_ref[l],
                    preferred_element_type=jnp.float32) + b_out_ref[l]    # [B*S, E]

    o_ref[...] = x.reshape(B, S, E)


@functools.partial(jax.jit, static_argnames=("return_sequences",))
def transformer_forward(x, w_in, b_in, w_out, b_out, return_sequences=True):
    """x: [B, S, E] f32. Fused params: w_in [L,E,3E] bf16, b_in [L,1,3E] f32,
       w_out [L,E,E] bf16, b_out [L,1,E] f32."""
    B, S, E = x.shape
    L = w_in.shape[0]

    flops = L * (2 * (B * S) * E * (3 * E)      # fused QKV projection
                 + 2 * B * S * S * E            # q @ k^T
                 + 2 * B * S * S * E            # p @ v
                 + 2 * (B * S) * E * E)         # output projection
    bytes_accessed = (w_in.size * 2 + w_out.size * 2          # bf16 weights
                      + b_in.size * 4 + b_out.size * 4        # f32 biases
                      + 2 * B * S * E * 4)                    # activation in + out

    full = lambda i: (0, 0, 0)
    out = pl.pallas_call(
        functools.partial(_transformer_kernel, layers=L, batch=B, seq=S, embed_dim=E),
        out_shape=jax.ShapeDtypeStruct((B, S, E), jnp.float32),
        grid=(1,),                               # single step: no per-batch grid overhead
        in_specs=[
            pl.BlockSpec((B, S, E), full),       # full activation
            pl.BlockSpec((L, E, 3 * E), full),   # fused W_in (all layers, bf16)
            pl.BlockSpec((L, 1, 3 * E), full),   # fused b_in (f32)
            pl.BlockSpec((L, E, E), full),       # W_out (all layers, bf16)
            pl.BlockSpec((L, 1, E), full),       # b_out (f32)
        ],
        out_specs=pl.BlockSpec((B, S, E), full),
        compiler_params=pltpu.CompilerParams(dimension_semantics=("arbitrary",)),
        cost_estimate=pl.CostEstimate(flops=flops,
                                      transcendentals=L * B * S * S,
                                      bytes_accessed=bytes_accessed),
    )(x, w_in, b_in, w_out, b_out)
    if return_sequences:
        return out
    return out[:, -1, :]


def init_layer_params(key, embed_dim):
    """Deterministic synthetic init mirroring nn.MultiheadAttention param shapes/init
    (in_proj_weight xavier-uniform, in_proj_bias / out_proj bias zeros)."""
    k_in, k_out = jax.random.split(key)
    limit = math.sqrt(6.0 / (3 * embed_dim + embed_dim))
    in_proj_w = jax.random.uniform(k_in, (3 * embed_dim, embed_dim),
                                   jnp.float32, -limit, limit)
    wq = in_proj_w[0:embed_dim]
    wk = in_proj_w[embed_dim:2 * embed_dim]
    wv = in_proj_w[2 * embed_dim:3 * embed_dim]
    bq = jnp.zeros((1, embed_dim), jnp.float32)
    bk = jnp.zeros((1, embed_dim), jnp.float32)
    bv = jnp.zeros((1, embed_dim), jnp.float32)
    lim_o = math.sqrt(1.0 / embed_dim)
    wo = jax.random.uniform(k_out, (embed_dim, embed_dim), jnp.float32, -lim_o, lim_o)
    bo = jnp.zeros((1, embed_dim), jnp.float32)
    return (wq, wk, wv, bq, bk, bv, wo, bo)


def prepare_fused_params(all_layer_params, embed_dim):
    """Done ONCE at parameter-prep time (outside jit): pre-transpose weights to
    [in, out], fold 1/sqrt(E) into Wq/bq, fuse QKV, stack layers, cast weights to
    bf16 (halves the dominant weight DMA; biases stay f32)."""
    scale = 1.0 / math.sqrt(embed_dim)
    w_in_l, b_in_l, w_out_l, b_out_l = [], [], [], []
    for (wq, wk, wv, bq, bk, bv, wo, bo) in all_layer_params:
        w_in = jnp.concatenate([wq.T * scale, wk.T, wv.T], axis=1)           # [E, 3E]
        b_in = jnp.concatenate([bq * scale, bk, bv], axis=1)                 # [1, 3E]
        w_in_l.append(w_in.astype(jnp.bfloat16))
        b_in_l.append(b_in)                                                  # f32
        w_out_l.append(wo.T.astype(jnp.bfloat16))                            # [E, E]
        b_out_l.append(bo)                                                   # [1, E] f32
    return (jnp.stack(w_in_l), jnp.stack(b_in_l),
            jnp.stack(w_out_l), jnp.stack(b_out_l))


def reference_forward(x, all_layer_params, embed_dim, return_sequences=True):
    """Pure-JAX f32 reference (PyTorch single-head MHA semantics) for validation."""
    scale = 1.0 / math.sqrt(embed_dim)
    for (wq, wk, wv, bq, bk, bv, wo, bo) in all_layer_params:
        q = x @ wq.T + bq
        k = x @ wk.T + bk
        v = x @ wv.T + bv
        s = jnp.einsum('bqe,bke->bqk', q, k) * scale
        p = jax.nn.softmax(s, axis=-1)
        a = jnp.einsum('bqk,bke->bqe', p, v)
        x = a @ wo.T + bo
    return x if return_sequences else x[:, -1, :]


if __name__ == "__main__":
    # TODO(synk): num_heads fixed at 1 (module default); multi-head would need a head split in-kernel.
    B, S, E = 2, 8, 128          # embed_dim=128 matches the module default (lane-dense)
    LAYERS = 3

    key = jax.random.PRNGKey(0)
    key, xk = jax.random.split(key)
    x = jax.random.normal(xk, (B, S, E), jnp.float32)

    layer_keys = jax.random.split(key, LAYERS)
    all_params = tuple(init_layer_params(k, E) for k in layer_keys)
    w_in, b_in, w_out, b_out = prepare_fused_params(all_params, E)

    out = transformer_forward(x, w_in, b_in, w_out, b_out, return_sequences=True)
    out = jax.block_until_ready(out)
    assert out.shape == (B, S, E), out.shape

    # Correctness check vs pure-JAX f32 reference (tolerance accounts for bf16
    # matmul operands; accumulation and softmax are f32 with an exact divide).
    ref = reference_forward(x, all_params, E, return_sequences=True)
    assert jnp.allclose(out, ref, atol=5e-2, rtol=5e-2), float(jnp.max(jnp.abs(out - ref)))

    print("KERNEL_OK")
</pallas_src>

<mosaic_0001>
module attributes {stable_mosaic.version = 11 : i64} {
  func.func @_transformer_kernel(%arg0: i32, %arg1: memref<2x8x128xf32, #tpu.memory_space<vmem>>, %arg2: memref<3x128x384xbf16, #tpu.memory_space<vmem>>, %arg3: memref<3x1x384xf32, #tpu.memory_space<vmem>>, %arg4: memref<3x128x128xbf16, #tpu.memory_space<vmem>>, %arg5: memref<3x1x128xf32, #tpu.memory_space<vmem>>, %arg6: memref<2x8x128xf32, #tpu.memory_space<vmem>>) attributes {dimension_semantics = [#tpu.dimension_semantics<arbitrary>], iteration_bounds = array<i64: 1>, scalar_prefetch = 0 : i64, scratch_operands = 0 : i64, tpu.core_type = #tpu.core_type<tc>, window_params = [{pipeline_mode = #tpu.pipeline_mode<synchronous>, transform_indices = @transform_0, window_bounds = array<i64: 2, 8, 128>}, {pipeline_mode = #tpu.pipeline_mode<synchronous>, transform_indices = @transform_1, window_bounds = array<i64: 3, 128, 384>}, {pipeline_mode = #tpu.pipeline_mode<synchronous>, transform_indices = @transform_2, window_bounds = array<i64: 3, 1, 384>}, {pipeline_mode = #tpu.pipeline_mode<synchronous>, transform_indices = @transform_3, window_bounds = array<i64: 3, 128, 128>}, {pipeline_mode = #tpu.pipeline_mode<synchronous>, transform_indices = @transform_4, window_bounds = array<i64: 3, 1, 128>}, {pipeline_mode = #tpu.pipeline_mode<synchronous>, transform_indices = @transform_5, window_bounds = array<i64: 2, 8, 128>}]} {
    %c0 = arith.constant 0 : index
    %c0_0 = arith.constant 0 : index
    %c0_1 = arith.constant 0 : index
    %0 = vector.load %arg1[%c0, %c0_0, %c0_1] : memref<2x8x128xf32, #tpu.memory_space<vmem>>, vector<2x8x128xf32>
    %1 = vector.shape_cast %0 : vector<2x8x128xf32> to vector<16x128xf32>
    %2 = arith.truncf %1 : vector<16x128xf32> to vector<16x128xbf16>
    %c0_2 = arith.constant 0 : index
    %c0_3 = arith.constant 0 : index
    %c0_4 = arith.constant 0 : index
    %3 = vector.load %arg2[%c0_2, %c0_3, %c0_4] : memref<3x128x384xbf16, #tpu.memory_space<vmem>>, vector<1x128x384xbf16>
    %4 = vector.shape_cast %3 : vector<1x128x384xbf16> to vector<128x384xbf16>
    %cst = arith.constant dense<0.000000e+00> : vector<16x384xf32>
    %5 = tpu.matmul %2, %4, %cst {dimension_numbers = #tpu.dot_dimension_numbers<[1], [0], [0], [1], [0, 0, 1, 1], [], []>} : vector<16x128xbf16>, vector<128x384xbf16>, vector<16x384xf32> -> vector<16x384xf32>
    %c0_5 = arith.constant 0 : index
    %c0_6 = arith.constant 0 : index
    %c0_7 = arith.constant 0 : index
    %6 = vector.load %arg3[%c0_5, %c0_6, %c0_7] : memref<3x1x384xf32, #tpu.memory_space<vmem>>, vector<1x1x384xf32>
    %7 = vector.shape_cast %6 : vector<1x1x384xf32> to vector<1x384xf32>
    %8 = vector.broadcast %7 : vector<1x384xf32> to vector<16x384xf32>
    %9 = arith.addf %5, %8 : vector<16x384xf32>
    %10 = vector.extract_strided_slice %9 {offsets = [0, 0], sizes = [16, 128], strides = [1, 1]} : vector<16x384xf32> to vector<16x128xf32>
    %11 = vector.shape_cast %10 : vector<16x128xf32> to vector<2x8x128xf32>
    %12 = vector.extract_strided_slice %9 {offsets = [0, 128], sizes = [16, 128], strides = [1, 1]} : vector<16x384xf32> to vector<16x128xf32>
    %13 = vector.shape_cast %12 : vector<16x128xf32> to vector<2x8x128xf32>
    %14 = vector.extract_strided_slice %9 {offsets = [0, 256], sizes = [16, 128], strides = [1, 1]} : vector<16x384xf32> to vector<16x128xf32>
    %15 = vector.shape_cast %14 : vector<16x128xf32> to vector<2x8x128xf32>
    %16 = arith.truncf %11 : vector<2x8x128xf32> to vector<2x8x128xbf16>
    %17 = arith.truncf %13 : vector<2x8x128xf32> to vector<2x8x128xbf16>
    %cst_8 = arith.constant dense<0.000000e+00> : vector<2x8x8xf32>
    %18 = tpu.matmul %16, %17, %cst_8 {dimension_numbers = #tpu.dot_dimension_numbers<[2], [2], [1], [1], [0, 0, 0, 1, 1, 1], [0], [0]>} : vector<2x8x128xbf16>, vector<2x8x128xbf16>, vector<2x8x8xf32> -> vector<2x8x8xf32>
    %cst_9 = arith.constant dense<0xFF800000> : vector<2x8xf32>
    %19 = vector.multi_reduction <maximumf>, %18, %cst_9 [2] : vector<2x8x8xf32> to vector<2x8xf32>
    %20 = vector.shape_cast %19 : vector<2x8xf32> to vector<2x8x1xf32>
    %21 = vector.broadcast %20 : vector<2x8x1xf32> to vector<2x8x8xf32>
    %22 = arith.subf %18, %21 : vector<2x8x8xf32>
    %23 = math.exp %22 : vector<2x8x8xf32>
    %cst_10 = arith.constant dense<0.000000e+00> : vector<2x8xf32>
    %24 = vector.multi_reduction <add>, %23, %cst_10 [2] : vector<2x8x8xf32> to vector<2x8xf32>
    %25 = vector.shape_cast %24 : vector<2x8xf32> to vector<2x8x1xf32>
    %26 = vector.broadcast %25 : vector<2x8x1xf32> to vector<2x8x8xf32>
    %27 = arith.divf %23, %26 : vector<2x8x8xf32>
    %28 = arith.truncf %27 : vector<2x8x8xf32> to vector<2x8x8xbf16>
    %29 = arith.truncf %15 : vector<2x8x128xf32> to vector<2x8x128xbf16>
    %cst_11 = arith.constant dense<0.000000e+00> : vector<2x8x128xf32>
    %30 = tpu.matmul %28, %29, %cst_11 {dimension_numbers = #tpu.dot_dimension_numbers<[2], [1], [1], [2], [0, 0, 0, 1, 1, 2], [0], [0]>} : vector<2x8x8xbf16>, vector<2x8x128xbf16>, vector<2x8x128xf32> -> vector<2x8x128xf32>
    %31 = vector.shape_cast %30 : vector<2x8x128xf32> to vector<16x128xf32>
    %32 = arith.truncf %31 : vector<16x128xf32> to vector<16x128xbf16>
    %c0_12 = arith.constant 0 : index
    %c0_13 = arith.constant 0 : index
    %c0_14 = arith.constant 0 : index
    %33 = vector.load %arg4[%c0_12, %c0_13, %c0_14] : memref<3x128x128xbf16, #tpu.memory_space<vmem>>, vector<1x128x128xbf16>
    %34 = vector.shape_cast %33 : vector<1x128x128xbf16> to vector<128x128xbf16>
    %cst_15 = arith.constant dense<0.000000e+00> : vector<16x128xf32>
    %35 = tpu.matmul %32, %34, %cst_15 {dimension_numbers = #tpu.dot_dimension_numbers<[1], [0], [0], [1], [0, 0, 1, 1], [], []>} : vector<16x128xbf16>, vector<128x128xbf16>, vector<16x128xf32> -> vector<16x128xf32>
    %c0_16 = arith.constant 0 : index
    %c0_17 = arith.constant 0 : index
    %c0_18 = arith.constant 0 : index
    %36 = vector.load %arg5[%c0_16, %c0_17, %c0_18] : memref<3x1x128xf32, #tpu.memory_space<vmem>>, vector<1x1x128xf32>
    %37 = vector.shape_cast %36 : vector<1x1x128xf32> to vector<1x128xf32>
    %38 = vector.broadcast %37 : vector<1x128xf32> to vector<16x128xf32>
    %39 = arith.addf %35, %38 : vector<16x128xf32>
    %40 = arith.truncf %39 : vector<16x128xf32> to vector<16x128xbf16>
    %c1 = arith.constant 1 : index
    %c0_19 = arith.constant 0 : index
    %c0_20 = arith.constant 0 : index
    %41 = vector.load %arg2[%c1, %c0_19, %c0_20] : memref<3x128x384xbf16, #tpu.memory_space<vmem>>, vector<1x128x384xbf16>
    %42 = vector.shape_cast %41 : vector<1x128x384xbf16> to vector<128x384xbf16>
    %cst_21 = arith.constant dense<0.000000e+00> : vector<16x384xf32>
    %43 = tpu.matmul %40, %42, %cst_21 {dimension_numbers = #tpu.dot_dimension_numbers<[1], [0], [0], [1], [0, 0, 1, 1], [], []>} : vector<16x128xbf16>, vector<128x384xbf16>, vector<16x384xf32> -> vector<16x384xf32>
    %c1_22 = arith.constant 1 : index
    %c0_23 = arith.constant 0 : index
    %c0_24 = arith.constant 0 : index
    %44 = vector.load %arg3[%c1_22, %c0_23, %c0_24] : memref<3x1x384xf32, #tpu.memory_space<vmem>>, vector<1x1x384xf32>
    %45 = vector.shape_cast %44 : vector<1x1x384xf32> to vector<1x384xf32>
    %46 = vector.broadcast %45 : vector<1x384xf32> to vector<16x384xf32>
    %47 = arith.addf %43, %46 : vector<16x384xf32>
    %48 = vector.extract_strided_slice %47 {offsets = [0, 0], sizes = [16, 128], strides = [1, 1]} : vector<16x384xf32> to vector<16x128xf32>
    %49 = vector.shape_cast %48 : vector<16x128xf32> to vector<2x8x128xf32>
    %50 = vector.extract_strided_slice %47 {offsets = [0, 128], sizes = [16, 128], strides = [1, 1]} : vector<16x384xf32> to vector<16x128xf32>
    %51 = vector.shape_cast %50 : vector<16x128xf32> to vector<2x8x128xf32>
    %52 = vector.extract_strided_slice %47 {offsets = [0, 256], sizes = [16, 128], strides = [1, 1]} : vector<16x384xf32> to vector<16x128xf32>
    %53 = vector.shape_cast %52 : vector<16x128xf32> to vector<2x8x128xf32>
    %54 = arith.truncf %49 : vector<2x8x128xf32> to vector<2x8x128xbf16>
    %55 = arith.truncf %51 : vector<2x8x128xf32> to vector<2x8x128xbf16>
    %cst_25 = arith.constant dense<0.000000e+00> : vector<2x8x8xf32>
    %56 = tpu.matmul %54, %55, %cst_25 {dimension_numbers = #tpu.dot_dimension_numbers<[2], [2], [1], [1], [0, 0, 0, 1, 1, 1], [0], [0]>} : vector<2x8x128xbf16>, vector<2x8x128xbf16>, vector<2x8x8xf32> -> vector<2x8x8xf32>
    %cst_26 = arith.constant dense<0xFF800000> : vector<2x8xf32>
    %57 = vector.multi_reduction <maximumf>, %56, %cst_26 [2] : vector<2x8x8xf32> to vector<2x8xf32>
    %58 = vector.shape_cast %57 : vector<2x8xf32> to vector<2x8x1xf32>
    %59 = vector.broadcast %58 : vector<2x8x1xf32> to vector<2x8x8xf32>
    %60 = arith.subf %56, %59 : vector<2x8x8xf32>
    %61 = math.exp %60 : vector<2x8x8xf32>
    %cst_27 = arith.constant dense<0.000000e+00> : vector<2x8xf32>
    %62 = vector.multi_reduction <add>, %61, %cst_27 [2] : vector<2x8x8xf32> to vector<2x8xf32>
    %63 = vector.shape_cast %62 : vector<2x8xf32> to vector<2x8x1xf32>
    %64 = vector.broadcast %63 : vector<2x8x1xf32> to vector<2x8x8xf32>
    %65 = arith.divf %61, %64 : vector<2x8x8xf32>
    %66 = arith.truncf %65 : vector<2x8x8xf32> to vector<2x8x8xbf16>
    %67 = arith.truncf %53 : vector<2x8x128xf32> to vector<2x8x128xbf16>
    %cst_28 = arith.constant dense<0.000000e+00> : vector<2x8x128xf32>
    %68 = tpu.matmul %66, %67, %cst_28 {dimension_numbers = #tpu.dot_dimension_numbers<[2], [1], [1], [2], [0, 0, 0, 1, 1, 2], [0], [0]>} : vector<2x8x8xbf16>, vector<2x8x128xbf16>, vector<2x8x128xf32> -> vector<2x8x128xf32>
    %69 = vector.shape_cast %68 : vector<2x8x128xf32> to vector<16x128xf32>
    %70 = arith.truncf %69 : vector<16x128xf32> to vector<16x128xbf16>
    %c1_29 = arith.constant 1 : index
    %c0_30 = arith.constant 0 : index
    %c0_31 = arith.constant 0 : index
    %71 = vector.load %arg4[%c1_29, %c0_30, %c0_31] : memref<3x128x128xbf16, #tpu.memory_space<vmem>>, vector<1x128x128xbf16>
    %72 = vector.shape_cast %71 : vector<1x128x128xbf16> to vector<128x128xbf16>
    %cst_32 = arith.constant dense<0.000000e+00> : vector<16x128xf32>
    %73 = tpu.matmul %70, %72, %cst_32 {dimension_numbers = #tpu.dot_dimension_numbers<[1], [0], [0], [1], [0, 0, 1, 1], [], []>} : vector<16x128xbf16>, vector<128x128xbf16>, vector<16x128xf32> -> vector<16x128xf32>
    %c1_33 = arith.constant 1 : index
    %c0_34 = arith.constant 0 : index
    %c0_35 = arith.constant 0 : index
    %74 = vector.load %arg5[%c1_33, %c0_34, %c0_35] : memref<3x1x128xf32, #tpu.memory_space<vmem>>, vector<1x1x128xf32>
    %75 = vector.shape_cast %74 : vector<1x1x128xf32> to vector<1x128xf32>
    %76 = vector.broadcast %75 : vector<1x128xf32> to vector<16x128xf32>
    %77 = arith.addf %73, %76 : vector<16x128xf32>
    %78 = arith.truncf %77 : vector<16x128xf32> to vector<16x128xbf16>
    %c2 = arith.constant 2 : index
    %c0_36 = arith.constant 0 : index
    %c0_37 = arith.constant 0 : index
    %79 = vector.load %arg2[%c2, %c0_36, %c0_37] : memref<3x128x384xbf16, #tpu.memory_space<vmem>>, vector<1x128x384xbf16>
    %80 = vector.shape_cast %79 : vector<1x128x384xbf16> to vector<128x384xbf16>
    %cst_38 = arith.constant dense<0.000000e+00> : vector<16x384xf32>
    %81 = tpu.matmul %78, %80, %cst_38 {dimension_numbers = #tpu.dot_dimension_numbers<[1], [0], [0], [1], [0, 0, 1, 1], [], []>} : vector<16x128xbf16>, vector<128x384xbf16>, vector<16x384xf32> -> vector<16x384xf32>
    %c2_39 = arith.constant 2 : index
    %c0_40 = arith.constant 0 : index
    %c0_41 = arith.constant 0 : index
    %82 = vector.load %arg3[%c2_39, %c0_40, %c0_41] : memref<3x1x384xf32, #tpu.memory_space<vmem>>, vector<1x1x384xf32>
    %83 = vector.shape_cast %82 : vector<1x1x384xf32> to vector<1x384xf32>
    %84 = vector.broadcast %83 : vector<1x384xf32> to vector<16x384xf32>
    %85 = arith.addf %81, %84 : vector<16x384xf32>
    %86 = vector.extract_strided_slice %85 {offsets = [0, 0], sizes = [16, 128], strides = [1, 1]} : vector<16x384xf32> to vector<16x128xf32>
    %87 = vector.shape_cast %86 : vector<16x128xf32> to vector<2x8x128xf32>
    %88 = vector.extract_strided_slice %85 {offsets = [0, 128], sizes = [16, 128], strides = [1, 1]} : vector<16x384xf32> to vector<16x128xf32>
    %89 = vector.shape_cast %88 : vector<16x128xf32> to vector<2x8x128xf32>
    %90 = vector.extract_strided_slice %85 {offsets = [0, 256], sizes = [16, 128], strides = [1, 1]} : vector<16x384xf32> to vector<16x128xf32>
    %91 = vector.shape_cast %90 : vector<16x128xf32> to vector<2x8x128xf32>
    %92 = arith.truncf %87 : vector<2x8x128xf32> to vector<2x8x128xbf16>
    %93 = arith.truncf %89 : vector<2x8x128xf32> to vector<2x8x128xbf16>
    %cst_42 = arith.constant dense<0.000000e+00> : vector<2x8x8xf32>
    %94 = tpu.matmul %92, %93, %cst_42 {dimension_numbers = #tpu.dot_dimension_numbers<[2], [2], [1], [1], [0, 0, 0, 1, 1, 1], [0], [0]>} : vector<2x8x128xbf16>, vector<2x8x128xbf16>, vector<2x8x8xf32> -> vector<2x8x8xf32>
    %cst_43 = arith.constant dense<0xFF800000> : vector<2x8xf32>
    %95 = vector.multi_reduction <maximumf>, %94, %cst_43 [2] : vector<2x8x8xf32> to vector<2x8xf32>
    %96 = vector.shape_cast %95 : vector<2x8xf32> to vector<2x8x1xf32>
    %97 = vector.broadcast %96 : vector<2x8x1xf32> to vector<2x8x8xf32>
    %98 = arith.subf %94, %97 : vector<2x8x8xf32>
    %99 = math.exp %98 : vector<2x8x8xf32>
    %cst_44 = arith.constant dense<0.000000e+00> : vector<2x8xf32>
    %100 = vector.multi_reduction <add>, %99, %cst_44 [2] : vector<2x8x8xf32> to vector<2x8xf32>
    %101 = vector.shape_cast %100 : vector<2x8xf32> to vector<2x8x1xf32>
    %102 = vector.broadcast %101 : vector<2x8x1xf32> to vector<2x8x8xf32>
    %103 = arith.divf %99, %102 : vector<2x8x8xf32>
    %104 = arith.truncf %103 : vector<2x8x8xf32> to vector<2x8x8xbf16>
    %105 = arith.truncf %91 : vector<2x8x128xf32> to vector<2x8x128xbf16>
    %cst_45 = arith.constant dense<0.000000e+00> : vector<2x8x128xf32>
    %106 = tpu.matmul %104, %105, %cst_45 {dimension_numbers = #tpu.dot_dimension_numbers<[2], [1], [1], [2], [0, 0, 0, 1, 1, 2], [0], [0]>} : vector<2x8x8xbf16>, vector<2x8x128xbf16>, vector<2x8x128xf32> -> vector<2x8x128xf32>
    %107 = vector.shape_cast %106 : vector<2x8x128xf32> to vector<16x128xf32>
    %108 = arith.truncf %107 : vector<16x128xf32> to vector<16x128xbf16>
    %c2_46 = arith.constant 2 : index
    %c0_47 = arith.constant 0 : index
    %c0_48 = arith.constant 0 : index
    %109 = vector.load %arg4[%c2_46, %c0_47, %c0_48] : memref<3x128x128xbf16, #tpu.memory_space<vmem>>, vector<1x128x128xbf16>
    %110 = vector.shape_cast %109 : vector<1x128x128xbf16> to vector<128x128xbf16>
    %cst_49 = arith.constant dense<0.000000e+00> : vector<16x128xf32>
    %111 = tpu.matmul %108, %110, %cst_49 {dimension_numbers = #tpu.dot_dimension_numbers<[1], [0], [0], [1], [0, 0, 1, 1], [], []>} : vector<16x128xbf16>, vector<128x128xbf16>, vector<16x128xf32> -> vector<16x128xf32>
    %c2_50 = arith.constant 2 : index
    %c0_51 = arith.constant 0 : index
    %c0_52 = arith.constant 0 : index
    %112 = vector.load %arg5[%c2_50, %c0_51, %c0_52] : memref<3x1x128xf32, #tpu.memory_space<vmem>>, vector<1x1x128xf32>
    %113 = vector.shape_cast %112 : vector<1x1x128xf32> to vector<1x128xf32>
    %114 = vector.broadcast %113 : vector<1x128xf32> to vector<16x128xf32>
    %115 = arith.addf %111, %114 : vector<16x128xf32>
    %116 = vector.shape_cast %115 : vector<16x128xf32> to vector<2x8x128xf32>
    %c0_53 = arith.constant 0 : index
    %c0_54 = arith.constant 0 : index
    %c0_55 = arith.constant 0 : index
    %117 = vector.load %arg6[%c0_53, %c0_54, %c0_55] : memref<2x8x128xf32, #tpu.memory_space<vmem>>, vector<2x8x128xf32>
    tpu.vector_store %arg6[%c0_53, %c0_54, %c0_55], %116 {strides = array<i32>} : memref<2x8x128xf32, #tpu.memory_space<vmem>>, vector<2x8x128xf32>,
    return
  }
  func.func @transform_0(%arg0: i32) -> (i32, i32, i32) {
    %c0_i32 = arith.constant 0 : i32
    %c0_i32_0 = arith.constant 0 : i32
    %c0_i32_1 = arith.constant 0 : i32
    %c0_i32_2 = arith.constant 0 : i32
    return %c0_i32, %c0_i32_0, %c0_i32_1 : i32, i32, i32
  }
  func.func @transform_1(%arg0: i32) -> (i32, i32, i32) {
    %c0_i32 = arith.constant 0 : i32
    %c0_i32_0 = arith.constant 0 : i32
    %c0_i32_1 = arith.constant 0 : i32
    %c0_i32_2 = arith.constant 0 : i32
    return %c0_i32, %c0_i32_0, %c0_i32_1 : i32, i32, i32
  }
  func.func @transform_2(%arg0: i32) -> (i32, i32, i32) {
    %c0_i32 = arith.constant 0 : i32
    %c0_i32_0 = arith.constant 0 : i32
    %c0_i32_1 = arith.constant 0 : i32
    %c0_i32_2 = arith.constant 0 : i32
    return %c0_i32, %c0_i32_0, %c0_i32_1 : i32, i32, i32
  }
  func.func @transform_3(%arg0: i32) -> (i32, i32, i32) {
    %c0_i32 = arith.constant 0 : i32
    %c0_i32_0 = arith.constant 0 : i32
    %c0_i32_1 = arith.constant 0 : i32
    %c0_i32_2 = arith.constant 0 : i32
    return %c0_i32, %c0_i32_0, %c0_i32_1 : i32, i32, i32
  }
  func.func @transform_4(%arg0: i32) -> (i32, i32, i32) {
    %c0_i32 = arith.constant 0 : i32
    %c0_i32_0 = arith.constant 0 : i32
    %c0_i32_1 = arith.constant 0 : i32
    %c0_i32_2 = arith.constant 0 : i32
    return %c0_i32, %c0_i32_0, %c0_i32_1 : i32, i32, i32
  }
  func.func @transform_5(%arg0: i32) -> (i32, i32, i32) {
    %c0_i32 = arith.constant 0 : i32
    %c0_i32_0 = arith.constant 0 : i32
    %c0_i32_1 = arith.constant 0 : i32
    %c0_i32_2 = arith.constant 0 : i32
    return %c0_i32, %c0_i32_0, %c0_i32_1 : i32, i32, i32
  }
}

</mosaic_0001>

<bundles_post_ra>
// kernel: transformer_forward.1
= control target key start
LH: loop header
LB: loop body
LE: loop exit
PB: predicated region body
PF: predicated region fallthrough
CT: control target
= control target key end

     0   :  { %10 = vsyncpa [#allocation3], 0  ;;  %s2763_s0 = inlined_call_operand.hbm [shape: f32[2,8,128], index: 0, kind: input, shape index: {}]   ;;  %s2764_s1 = inlined_call_operand.hbm [shape: bf16[3,128,384], index: 1, kind: input, shape index: {}]   ;;  %s2765_s2 = inlined_call_operand.hbm [shape: f32[3,1,384], index: 2, kind: input, shape index: {}]   ;;  %s2766_s3 = inlined_call_operand.hbm [shape: bf16[3,128,128], index: 3, kind: input, shape index: {}]   ;;  %s2767_s4 = inlined_call_operand.vmem [shape: f32[3,1,128], index: 4, kind: input, shape index: {}]   ;;  %s2768_s5 = inlined_call_operand.hbm [shape: f32[2,8,128], index: 5, kind: output, shape index: {}]  }
   0x1   :  { %11 = vsyncpa [#allocation6], 0 }
   0x2   :  { %12 = vsyncpa [#allocation9], 0 }
   0x3   :  { %13 = vsyncpa [#allocation4], 0  ;;  %s2496_s18 = smov [#allocation5]   ;;  %s2378_s22 = scalar_lea.hbm %s2764_s1, 9216 }
   0x4   :  { %s31_s19 = sshll.u32 %s2496_s18, 4  ;;  %p2379_p0 = scmp.ne.s32.totalorder %s2764_s1, %s2378_s22  ;;  %s32_s19 = int_to_ptr.vmem [resolvable:$true] %s31_s19 }
   0x5   :  { %p2382_p1 = scmp.lt.u32.totalorder %s2378_s22, %s2764_s1 }
   0x7   :  { %p2384_p2 = pnand %p2382_p1, %p2379_p0 }
   0x9   :  { %2387 = shalt.err (!%p2384_p2)
}
   0xa   :  { %s2388_s27 = scalar_lea.vmem %s32_s19, 9216  ;;  %p2393_p4 = scmp.lt.s32.totalorder %s32_s19, %s32_s19 }
   0xb   :  { %p2389_p3 = scmp.ne.s32.totalorder %s32_s19, %s2388_s27  ;;  %p2394_p5 = scmp.lt.s32.totalorder %s2388_s27, %s2388_s27 }
   0xd   :  { %p2395_p6 = por %p2394_p5, %p2393_p4 }
   0xf   :  { %p2396_p7 = pnand %p2395_p6, %p2389_p3 }
  0x11   :  { %2399 = shalt.err (!%p2396_p7)
}
  0x12   :  { %s2497_s28 = smov 192   ;;  %s2498_s29 = smov 12  }
  0x13   :  { %37 = dma.hbm_to_vmem [thread:$0]  %s2764_s1, 9216, %s32_s19, [#allocation6], %s2497_s28, %s2497_s28, %s2498_s29  }
  0x14   :  { %s2499_s7 = smov [#allocation2]   ;;  %s2400_s11 = scalar_lea.hbm %s2763_s0, 256 }
  0x15   :  { %s19_s8 = sshll.u32 %s2499_s7, 4  ;;  %p2401_p8 = scmp.ne.s32.totalorder %s2763_s0, %s2400_s11  ;;  %s20_s8 = int_to_ptr.vmem [resolvable:$true] %s19_s8 }
  0x16   :  { %p2404_p9 = scmp.lt.u32.totalorder %s2400_s11, %s2763_s0 }
  0x18   :  { %p2406_p10 = pnand %p2404_p9, %p2401_p8 }
  0x1a   :  { %2409 = shalt.err (!%p2406_p10)
}
  0x1b   :  { %s2410_s16 = scalar_lea.vmem %s20_s8, 256  ;;  %p2415_p12 = scmp.lt.s32.totalorder %s20_s8, %s20_s8 }
  0x1c   :  { %p2411_p11 = scmp.ne.s32.totalorder %s20_s8, %s2410_s16  ;;  %p2416_p13 = scmp.lt.s32.totalorder %s2410_s16, %s2410_s16 }
  0x1e   :  { %p2417_p0 = por %p2416_p13, %p2415_p12 }
  0x20   :  { %p2418_p1 = pnand %p2417_p0, %p2411_p11 }
  0x22   :  { %2421 = shalt.err (!%p2418_p1)
}
  0x23   :  { %s2500_s1 = smov 128   ;;  %s2501_s17 = smov 8  }
  0x24   :  { %25 = dma.hbm_to_vmem [thread:$0]  %s2763_s0, 256, %s20_s8, [#allocation3], %s2500_s1, %s2500_s1, %s2501_s17  }
  0x25   :  { %s2502_s20 = smov [#allocation7]   ;;  %s2422_s24 = scalar_lea.hbm %s2765_s2, 144 }
  0x26   :  { %s43_s21 = sshll.u32 %s2502_s20, 4  ;;  %p2423_p2 = scmp.ne.s32.totalorder %s2765_s2, %s2422_s24  ;;  %s44_s21 = int_to_ptr.vmem [resolvable:$true] %s43_s21 }
  0x27   :  { %p2426_p3 = scmp.lt.u32.totalorder %s2422_s24, %s2765_s2 }
  0x29   :  { %p2428_p4 = pnand %p2426_p3, %p2423_p2 }
  0x2b   :  { %2431 = shalt.err (!%p2428_p4)
}
  0x2c   :  { %s2432_s29 = scalar_lea.vmem %s44_s21, 144  ;;  %s2436_s0 = scalar_lea.vmem %s44_s21, 160 }
  0x2d   :  { %p2433_p5 = scmp.ne.s32.totalorder %s44_s21, %s2432_s29  ;;  %p2437_p6 = scmp.lt.s32.totalorder %s44_s21, %s44_s21 }
  0x2e   :  { %p2438_p7 = scmp.lt.s32.totalorder %s2436_s0, %s2432_s29 }
  0x30   :  { %p2439_p8 = por %p2438_p7, %p2437_p6 }
  0x32   :  { %p2440_p9 = pnand %p2439_p8, %p2433_p5 }
  0x34   :  { %2443 = shalt.err (!%p2440_p9)
}
  0x35   :  { %s2503_s30 = smov 48   ;;  %s2504_s6 = smov 3  }
  0x36   :  { %49 = dma.hbm_to_vmem [thread:$0]  %s2765_s2, 144, %s44_s21, [#allocation6], %s2503_s30, %s2503_s30, %s2504_s6  }
  0x37   :  { %s2505_s9 = smov [#allocation8]   ;;  %s2444_s13 = scalar_lea.hbm %s2766_s3, 3072 }
  0x38   :  { %s55_s10 = sshll.u32 %s2505_s9, 4  ;;  %p2445_p10 = scmp.ne.s32.totalorder %s2766_s3, %s2444_s13  ;;  %s56_s10 = int_to_ptr.vmem [resolvable:$true] %s55_s10 }
  0x39   :  { %p2448_p11 = scmp.lt.u32.totalorder %s2444_s13, %s2766_s3 }
  0x3b   :  { %p2450_p12 = pnand %p2448_p11, %p2445_p10 }
  0x3d   :  { %2453 = shalt.err (!%p2450_p12)
}
  0x3e   :  { %s2454_s19 = scalar_lea.vmem %s56_s10, 3072  ;;  %p2459_p0 = scmp.lt.s32.totalorder %s56_s10, %s56_s10 }
  0x3f   :  { %p2455_p13 = scmp.ne.s32.totalorder %s56_s10, %s2454_s19  ;;  %p2460_p1 = scmp.lt.s32.totalorder %s2454_s19, %s2454_s19 }
  0x41   :  { %p2461_p2 = por %p2460_p1, %p2459_p0 }
  0x43   :  { %p2462_p3 = pnand %p2461_p2, %p2455_p13 }
  0x45   :  { %2465 = shalt.err (!%p2462_p3)
}
  0x46   :  { %s2506_s2 = smov 64   ;;  %s2507_s20 = smov 4  }
  0x47   :  { %61 = dma.hbm_to_vmem [thread:$0]  %s2766_s3, 3072, %s56_s10, [#allocation9], %s2506_s2, %s2506_s2, %s2507_s20  }
  0x48   :  { %2488 = dma.done.wait [#allocation3], 256  }
  0x49   :  { %2489 = vsyncadd [#allocation3], 4294967040 }
  0x4a   :  { %2490 = dma.done.wait [#allocation6], 9360  }
  0x4b   :  { %2491 = vsyncadd [#allocation6], 4294957936 }
  0x4c   :  { %2492 = dma.done.wait [#allocation9], 3072  }
  0x4d   :  { %2493 = vsyncadd [#allocation9], 4294964224  ;;  %v2508_v0 = vmov 0   ;;  %v2509_v1 = vmov 0.0   ;;  %v2234_v2 = vld [vmem:[#allocation5 + $0x4] ss:$12 sps:$4 sm:$0xff]   ;;  %v114_v29 = vlaneseq }
  0x4e   :  { %289 = vmatprep.mubr.bf16.mxu0 %v2508_v0  ;;  %2026 = vmatprep.subr.bf16.mxu1 %v2509_v1  ;;  %v2236_v3 = vld [vmem:[#allocation5] ss:$12 sps:$4 sm:$0xff]   ;;  %v2237_v4 = vld [vmem:[#allocation5 + $0x1c] ss:$12 sps:$4 sm:$0xff]   ;;  %v2239_v5 = vld [vmem:[#allocation5 + $0x18] ss:$12 sps:$4 sm:$0xff]  }
  0x4f   :  { %257 = vmatprep.subr.bf16.mxu0 %v2234_v2  ;;  %v2240_v6 = vld [vmem:[#allocation5 + $0x34] ss:$12 sps:$4 sm:$0xff]   ;;  %v2242_v7 = vld [vmem:[#allocation5 + $0x30] ss:$12 sps:$4 sm:$0xff]   ;;  %v2243_v8 = vld [vmem:[#allocation5 + $0x4c] ss:$12 sps:$4 sm:$0xff]  }
  0x50   :  { %258 = vmatpush1.bf16.msra.mxu0 %v2236_v3  ;;  %v2245_v9 = vld [vmem:[#allocation5 + $0x48] ss:$12 sps:$4 sm:$0xff]   ;;  %v2246_v10 = vld [vmem:[#allocation5 + $0x64] ss:$12 sps:$4 sm:$0xff]   ;;  %v2259_v12 = vld [vmem:[#allocation5 + $0x20] ss:$12 sps:$4 sm:$0xff]  }
  0x51   :  { %259 = vmatprep.subr.bf16.mxu0 %v2237_v4  ;;  %v2258_v11 = vld [vmem:[#allocation5 + $0x8] ss:$12 sps:$4 sm:$0xff]   ;;  %v2248_v13 = vld [vmem:[#allocation5 + $0x60] ss:$12 sps:$4 sm:$0xff]   ;;  %v2260_v15 = vld [vmem:[#allocation5 + $0x38] ss:$12 sps:$4 sm:$0xff]  }
  0x52   :  { %2027 = vmatpush3.bf16.msra.mxu1 %v2258_v11  ;;  %v2249_v14 = vld [vmem:[#allocation5 + $0x7c] ss:$12 sps:$4 sm:$0xff]   ;;  %v2251_v16 = vld [vmem:[#allocation5 + $0x78] ss:$12 sps:$4 sm:$0xff]   ;;  %v2252_v17 = vld [vmem:[#allocation5 + $0x94] ss:$12 sps:$4 sm:$0xff]  }
  0x53   :  { %2028 = vmatprep.subr.bf16.mxu1 %v2509_v1  ;;  %v2261_v18 = vld [vmem:[#allocation5 + $0x50] ss:$12 sps:$4 sm:$0xff]   ;;  %v2255_v20 = vld [vmem:[#allocation5 + $0xac] ss:$12 sps:$4 sm:$0xff]   ;;  %v2262_v21 = vld [vmem:[#allocation5 + $0x68] ss:$12 sps:$4 sm:$0xff]  }
  0x54   :  { %260 = vmatpush1.bf16.msra.mxu0 %v2239_v5  ;;  %v2254_v19 = vld [vmem:[#allocation5 + $0x90] ss:$12 sps:$4 sm:$0xff]   ;;  %v2257_v22 = vld [vmem:[#allocation5 + $0xa8] ss:$12 sps:$4 sm:$0xff]   ;;  %v2263_v25 = vld [vmem:[#allocation5 + $0x80] ss:$12 sps:$4 sm:$0xff]  }
  0x55   :  { %261 = vmatprep.subr.bf16.mxu0 %v2240_v6  ;;  %v77_v23 = vld [vmem:[#allocation2] sm:$0xff]  ;;  %v78_v24 = vld [vmem:[#allocation2 + $0x8] sm:$0xff]  ;;  %vm2510_vm0 = vmmov 0   ;;  %v115_v30 = vshrl.u32 %v114_v29, 7  ;;  %v112_v32 = vld [vmem:[#allocation7] sm:$0x7] }
  0x56   :  { %2029 = vmatpush3.bf16.msra.mxu1 %v2259_v12  ;;  %v79_v26 = vpack.c.bf16 %v78_v24, %v77_v23  ;;  %v2264_v27 = vld [vmem:[#allocation5 + $0x98] ss:$12 sps:$4 sm:$0xff]   ;;  %v2265_v28 = vld [vmem:[#allocation5 + $0xb0] ss:$12 sps:$4 sm:$0xff]   ;;  %2042 = vmatprep.mubr.msk.bf16.mxu1 %vm2510_vm0, %v2509_v1  ;;  %vm455_vm1 = vcmask 1043456   ;;  %vm425_vm2 = vcmask 64512  }
  0x57   :  { %2030 = vmatprep.subr.bf16.mxu1 %v2509_v1  ;;  %v2610_v31 = vsub.s32 1, %v115_v30  ;;  %v2613_v34 = vsub.s32 0, %v115_v30  ;;  %v2622_v48 = vsub.s32 2, %v115_v30  ;;  %s2511_s28 = smov [#allocation10]  }
  0x58   :  { %262 = vmatpush1.bf16.msra.mxu0 %v2242_v7  ;;  %s1827_s29 = sshll.u32 %s2511_s28, 4  ;;  %s1828_s29 = int_to_ptr.vmem [resolvable:$true] %s1827_s29 }
  0x59   :  { %263 = vmatprep.subr.bf16.mxu0 %v2243_v8  ;;  %v121_v33 = vrot.slane %v112_v32, %v2610_v31  ;;  %v117_v39 = vrot.slane %v112_v32, %v2613_v34  ;;  %v125_v49 = vrot.slane %v112_v32, %v2622_v48  ;;  %v2271_v32 = vld [vmem:[#allocation8 + $0x28] sm:$0xff]   ;;  %s2466_s0 = scalar_lea.vmem %s1828_s29, 256  ;;  %p2471_p5 = scmp.lt.s32.totalorder %s1828_s29, %s1828_s29 }
  0x5a   :  { %2031 = vmatpush3.bf16.msra.mxu1 %v2260_v15  ;;  %p2467_p4 = scmp.ne.s32.totalorder %s1828_s29, %s2466_s0  ;;  %p2472_p6 = scmp.lt.s32.totalorder %s2466_s0, %s2466_s0 }
  0x5b   :  { %2032 = vmatprep.subr.bf16.mxu1 %v2509_v1 }
  0x5c   :  { %264 = vmatpush1.bf16.msra.mxu0 %v2245_v9  ;;  %p2473_p7 = por %p2472_p6, %p2471_p5 }
  0x5d   :  { %265 = vmatprep.subr.bf16.mxu0 %v2246_v10 }
  0x5e   :  { %2033 = vmatpush3.bf16.msra.mxu1 %v2261_v18  ;;  %v2268_v18 = vld [vmem:[#allocation8 + $0x10] sm:$0xff]   ;;  %p2474_p8 = pnand %p2473_p7, %p2467_p4 }
  0x5f   :  { %2034 = vmatprep.subr.bf16.mxu1 %v2509_v1 }
  0x60   :  { %266 = vmatpush1.bf16.msra.mxu0 %v2248_v13 }
  0x61   :  { %267 = vmatprep.subr.bf16.mxu0 %v2249_v14 }
  0x62   :  { %2035 = vmatpush3.bf16.msra.mxu1 %v2262_v21 }
  0x63   :  { %2036 = vmatprep.subr.bf16.mxu1 %v2509_v1 }
  0x64   :  { %268 = vmatpush1.bf16.msra.mxu0 %v2251_v16  ;;  %v2266_v16 = vld [vmem:[#allocation8] sm:$0xff]  }
  0x65   :  { %269 = vmatprep.subr.bf16.mxu0 %v2252_v17  ;;  %v2267_v17 = vld [vmem:[#allocation8 + $0x8] sm:$0xff]  }
  0x66   :  { %2037 = vmatpush3.bf16.msra.mxu1 %v2263_v25 }
  0x67   :  { %2038 = vmatprep.subr.bf16.mxu1 %v2509_v1 }
  0x68   :  { %270 = vmatpush1.bf16.msra.mxu0 %v2254_v19  ;;  %v2269_v19 = vld [vmem:[#allocation8 + $0x18] sm:$0xff]  }
  0x69   :  { %271 = vmatprep.subr.bf16.mxu0 %v2255_v20  ;;  %v2270_v20 = vld [vmem:[#allocation8 + $0x20] sm:$0xff]  }
  0x6a   :  { %2039 = vmatpush3.bf16.msra.mxu1 %v2264_v27 }
  0x6b   :  { %2040 = vmatprep.subr.bf16.mxu1 %v2509_v1 }
  0x6c   :  { %272 = vmatpush1.bf16.msra.mxu0 %v2257_v22 }
  0x6d   :  { %2070 = vmatprep.subr.bf16.mxu0 %v2509_v1 }
  0x6e   :  { %2041 = vmatpush3.bf16.msra.mxu1 %v2265_v28 }
  0x6f   :  { %290 = vmatmul.mubr.bf16.vlgmr.msra.gmra.mrb[0].mxu0 %v79_v26  ;;  %2046 = vmatprep.subr.bf16.mxu1 %v2509_v1 }
  0x70   :  { %2086 = vmatprep.mubr.msk.bf16.mxu0 %vm2510_vm0, %v2509_v1  ;;  %2071 = vmatpush3.bf16.msra.mxu0 %v2266_v16  ;;  %v693_v16 = vld [vmem:[#allocation7 + $0x3] sm:$0x7] }
  0x71   :  { %2043 = vmatmul.mubr.bf16.vlgmr.msra.gmra.mrb[0].mxu1 %v79_v26  ;;  %2072 = vmatprep.subr.bf16.mxu0 %v2509_v1 }
  0x72   :  { %2048 = vmatprep.mubr.msk.bf16.mxu1 %vm2510_vm0, %v2509_v1 }
  0x74   :  { %2073 = vmatpush3.bf16.msra.mxu0 %v2267_v17  ;;  %v702_v17 = vrot.slane %v693_v16, %v2610_v31 }
  0x75   :  { %2074 = vmatprep.subr.bf16.mxu0 %v2509_v1 }
  0x78   :  { %2075 = vmatpush3.bf16.msra.mxu0 %v2268_v18 }
  0x79   :  { %2076 = vmatprep.subr.bf16.mxu0 %v2509_v1 }
  0x7c   :  { %2077 = vmatpush3.bf16.msra.mxu0 %v2269_v19 }
  0x7d   :  { %2078 = vmatprep.subr.bf16.mxu0 %v2509_v1 }
  0x80   :  { %2079 = vmatpush3.bf16.msra.mxu0 %v2270_v20  ;;  %v706_v20 = vrot.slane %v693_v16, %v2622_v48 }
  0x81   :  { %2080 = vmatprep.subr.bf16.mxu0 %v2509_v1 }
  0x84   :  { %2081 = vmatpush3.bf16.msra.mxu0 %v2271_v32 }
  0x85   :  { %2082 = vmatprep.subr.bf16.mxu0 %v2509_v1 }
 0x142   :  { %v291_v35 = vpop.f32.mrb[0].mxu0 }
 0x143   :  { %v293_v36 = vpop.f32.mrb[1].mxu0  ;;  %v292_v42 = vadd.f32 %v291_v35, %v117_v39  ;;  %v2273_v35 = vld [vmem:[#allocation8 + $0x38] sm:$0xff]  }
 0x144   :  { %v294_v37 = vadd.f32 %v293_v36, %v121_v33  ;;  %v295_v38 = vpop.f32.mrb[2].mxu0  ;;  %v334_v50 = vpop.f32.mrb[0].mxu1  ;;  %v2274_v36 = vld [vmem:[#allocation5 + $0xc0] ss:$12 sps:$4 sm:$0xff]  }
 0x145   :  { %v297_v40 = vpop.f32.mrb[3].mxu0  ;;  %v341_v44 = vpack.c.bf16 %v292_v42, %v292_v42  ;;  %v296_v46 = vadd.f32 %v295_v38, %v117_v39  ;;  %v335_v51 = vadd.f32 %v334_v50, %v125_v49  ;;  %v2044_v52 = vpop.f32.mrb[1].mxu1  ;;  %v2280_v38 = vld [vmem:[#allocation5 + $0xdc] ss:$12 sps:$4 sm:$0xff]   ;;  %v2278_v39 = vld [vmem:[#allocation5 + $0xd8] ss:$12 sps:$4 sm:$0xff]  }
 0x146   :  { %v343_v41 = vpack.c.bf16 %v294_v37, %v294_v37  ;;  %v298_v43 = vadd.f32 %v297_v40, %v121_v33  ;;  %v337_v53 = vpop.f32.mrb[2].mxu1  ;;  %v2272_v33 = vld [vmem:[#allocation8 + $0x30] sm:$0xff]   ;;  %v2276_v37 = vld [vmem:[#allocation5 + $0xc4] ss:$12 sps:$4 sm:$0xff]  }
 0x147   :  { %v342_v47 = vpack.c.bf16 %v296_v46, %v296_v46  ;;  %v450_v54 = vpack.c.bf16 %v335_v51, %v335_v51  ;;  %v338_v55 = vadd.f32 %v337_v53, %v125_v49  ;;  %v2045_v56 = vpop.f32.mrb[3].mxu1  ;;  %2083 = vmatpush3.bf16.msra.mxu0 %v2272_v33  ;;  %v2284_v40 = vld [vmem:[#allocation5 + $0xf4] ss:$12 sps:$4 sm:$0xff]   ;;  %v2288_v42 = vld [vmem:[#allocation5 + $0x10c] ss:$12 sps:$4 sm:$0xff]  }
 0x148   :  { %2047 = vmatpush3.bf16.xpose.msra.mxu1 %v343_v41  ;;  %v344_v45 = vpack.c.bf16 %v298_v43, %v298_v43  ;;  %2084 = vmatprep.subr.bf16.mxu0 %v2509_v1  ;;  %v2282_v41 = vld [vmem:[#allocation5 + $0xf0] ss:$12 sps:$4 sm:$0xff]   ;;  %v2286_v43 = vld [vmem:[#allocation5 + $0x108] ss:$12 sps:$4 sm:$0xff]  }
 0x149   :  { %2052 = vmatprep.subr.bf16.mxu1 %v2509_v1  ;;  %v457_v57 = vsel %vm455_vm1, %v450_v54, 0  ;;  %v451_v24 = vpack.c.bf16 %v338_v55, %v338_v55  ;;  %v2296_v46 = vld [vmem:[#allocation5 + $0x13c] ss:$12 sps:$4 sm:$0xff]   ;;  %v2300_v49 = vld [vmem:[#allocation5 + $0x154] ss:$12 sps:$4 sm:$0xff]  }
 0x14a   :  { %v2298_v50 = vld [vmem:[#allocation5 + $0x150] ss:$12 sps:$4 sm:$0xff]   ;;  %v2277_v56 = vld [vmem:[#allocation5 + $0xc8] ss:$12 sps:$4 sm:$0xff]  }
 0x14b   :  { %v503_v27 = vsel %vm455_vm1, %v451_v24, 0  ;;  %2085 = vmatpush3.bf16.msra.mxu0 %v2273_v35 }
 0x14c   :  { %2090 = vmatprep.subr.bf16.mxu0 %v2509_v1 }
 0x14f   :  { %2049 = vmatmul.mubr.bf16.vlgmr.msra.gmra.mrb[4].mxu1 %v341_v44  ;;  %v2292_v44 = vld [vmem:[#allocation5 + $0x124] ss:$12 sps:$4 sm:$0xff]  }
 0x150   :  { %2053 = vmatpush3.bf16.xpose.msra.mxu1 %v344_v45  ;;  %2054 = vmatprep.mubr.msk.bf16.mxu1 %vm2510_vm0, %v2509_v1  ;;  %v2290_v45 = vld [vmem:[#allocation5 + $0x120] ss:$12 sps:$4 sm:$0xff]  }
 0x151   :  { %2058 = vmatprep.subr.bf16.mxu1 %v2509_v1 }
 0x157   :  { %2055 = vmatmul.mubr.bf16.vlgmr.msra.gmra.mrb[8].mxu1 %v342_v47  ;;  %v2294_v47 = vld [vmem:[#allocation5 + $0x138] ss:$12 sps:$4 sm:$0xff]  }
 0x158   :  { %2060 = vmatprep.mubr.msk.bf16.mxu1 %vm2510_vm0, %v2509_v1  ;;  %2059 = vmatpush3.bf16.msra.mxu1 %v457_v57 }
 0x159   :  { %2064 = vmatprep.subr.bf16.mxu1 %v2509_v1 }
 0x222   :  { %v379_v58 = vpop.f32.mrb[4].mxu1 }
 0x223   :  { %v2050_v59 = vpop.f32.mrb[5].mxu1  ;;  %v426_v60 = vsel %vm425_vm2, %v379_v58, -inf }
 0x224   :  { %427 = vmax.xlane.f32.xlu0 %v426_v60  ;;  %v382_v61 = vpop.f32.mrb[6].mxu1 }
 0x225   :  { %v2051_v62 = vpop.f32.mrb[7].mxu1  ;;  %v2281_v61 = vld [vmem:[#allocation5 + $0xe0] ss:$12 sps:$4 sm:$0xff]  }
 0x226   :  { %v2285_v62 = vld [vmem:[#allocation5 + $0xf8] ss:$12 sps:$4 sm:$0xff]  }
 0x22a   :  { %v419_v63 = vpop.f32.mrb[8].mxu1 }
 0x22b   :  { %v2056_v2 = vpop.f32.mrb[9].mxu1  ;;  %v429_v3 = vsel %vm425_vm2, %v419_v63, -inf }
 0x22c   :  { %430 = vmax.xlane.f32.xlu0 %v429_v3  ;;  %v422_v4 = vpop.f32.mrb[10].mxu1  ;;  %v2293_v2 = vld [vmem:[#allocation5 + $0x128] ss:$12 sps:$4 sm:$0xff]   ;;  %v2297_v3 = vld [vmem:[#allocation5 + $0x140] ss:$12 sps:$4 sm:$0xff]  }
 0x22d   :  { %v2057_v5 = vpop.f32.mrb[11].mxu1  ;;  %v2301_v4 = vld [vmem:[#allocation5 + $0x158] ss:$12 sps:$4 sm:$0xff]  }
 0x22e   :  { %v2304_v5 = vld [vmem:[#allocation5 + $0x16c] ss:$12 sps:$4 sm:$0xff]  }
 0x2b1   :  { %v428_v6 = vpop.xlane.xlu0 %427 }
 0x2b2   :  { %v432_v7 = vsub.f32 %v379_v58, %v428_v6  ;;  %v2302_v6 = vld [vmem:[#allocation5 + $0x168] ss:$12 sps:$4 sm:$0xff]  }
 0x2b4   :  { %v434_v8 = vmul.f32 1.442695, %v432_v7  ;;  %v2305_v7 = vld [vmem:[#allocation5 + $0x170] ss:$12 sps:$4 sm:$0xff]  }
 0x2b6   :  { %2354 = vpow2.f32 %v434_v8  ;;  %v1867_v8 = vld [vmem:[%s2767_s4] ss:$0 sm:$0xff] }
 0x2b9   :  { %v431_v9 = vpop.xlane.xlu0 %430 }
 0x2ba   :  { %v433_v10 = vsub.f32 %v419_v63, %v431_v9  ;;  %v2289_v63 = vld [vmem:[#allocation5 + $0x110] ss:$12 sps:$4 sm:$0xff]  }
 0x2bc   :  { %v436_v11 = vmul.f32 1.442695, %v433_v10 }
 0x2be   :  { %2356 = vpow2.f32 %v436_v11 }
 0x2c0   :  { %v2355_v12 = vpop.eup %2354 }
 0x2c1   :  { %v438_v13 = vsel %vm425_vm2, %v2355_v12, 0.0 }
 0x2c2   :  { %439 = vadd.xlane.f32.xlu1 %v438_v13 }
 0x2c8   :  { %v2357_v14 = vpop.eup %2356 }
 0x2c9   :  { %v441_v15 = vsel %vm425_vm2, %v2357_v14, 0.0 }
 0x2ca   :  { %442 = vadd.xlane.f32.xlu1 %v441_v15 }
 0x34f   :  { %v440_v21 = vpop.xlane.xlu1 %439 }
 0x350   :  { %2358 = vrcp.f32 %v440_v21 }
 0x357   :  { %v443_v22 = vpop.xlane.xlu1 %442 }
 0x358   :  { %2360 = vrcp.f32 %v443_v22 }
 0x35a   :  { %v2359_v23 = vpop.eup %2358 }
 0x35b   :  { %v445_v25 = vmul.f32 %v2359_v23, %v2355_v12 }
 0x35d   :  { %v448_v26 = vpack.c.bf16 %v445_v25, %v445_v25 }
 0x35f   :  { %2061 = vmatmul.mubr.msk.bf16.vlgmr.msra.gmra.mrb[12].mxu1 %vm425_vm2, %v448_v26  ;;  %v698_v26 = vrot.slane %v693_v16, %v2613_v34  ;;  %v2311_v16 = vld [vmem:[#allocation8 + $0x68] sm:$0xff]  }
 0x360   :  { %2065 = vmatpush3.bf16.msra.mxu1 %v503_v27  ;;  %2066 = vmatprep.mubr.msk.bf16.mxu1 %vm2510_vm0, %v2509_v1 }
 0x361   :  { %838 = vmatprep.subr.bf16.mxu1 %v2276_v37 }
 0x362   :  { %v2361_v28 = vpop.eup %2360 }
 0x363   :  { %v447_v29 = vmul.f32 %v2361_v28, %v2357_v14 }
 0x365   :  { %v449_v30 = vpack.c.bf16 %v447_v29, %v447_v29 }
 0x367   :  { %2067 = vmatmul.mubr.msk.bf16.vlgmr.msra.gmra.mrb[16].mxu1 %vm425_vm2, %v449_v30 }
 0x368   :  { %870 = vmatprep.mubr.bf16.mxu1 %v2508_v0  ;;  %839 = vmatpush1.bf16.msra.mxu1 %v2274_v36 }
 0x369   :  { %840 = vmatprep.subr.bf16.mxu1 %v2280_v38 }
 0x36c   :  { %841 = vmatpush1.bf16.msra.mxu1 %v2278_v39 }
 0x36d   :  { %842 = vmatprep.subr.bf16.mxu1 %v2284_v40 }
 0x370   :  { %843 = vmatpush1.bf16.msra.mxu1 %v2282_v41 }
 0x371   :  { %844 = vmatprep.subr.bf16.mxu1 %v2288_v42 }
 0x374   :  { %845 = vmatpush1.bf16.msra.mxu1 %v2286_v43 }
 0x375   :  { %846 = vmatprep.subr.bf16.mxu1 %v2292_v44 }
 0x378   :  { %847 = vmatpush1.bf16.msra.mxu1 %v2290_v45 }
 0x379   :  { %848 = vmatprep.subr.bf16.mxu1 %v2296_v46 }
 0x37c   :  { %849 = vmatpush1.bf16.msra.mxu1 %v2294_v47 }
 0x37d   :  { %850 = vmatprep.subr.bf16.mxu1 %v2300_v49 }
 0x380   :  { %851 = vmatpush1.bf16.msra.mxu1 %v2298_v50 }
 0x381   :  { %852 = vmatprep.subr.bf16.mxu1 %v2304_v5  ;;  %v2310_v5 = vld [vmem:[#allocation8 + $0x60] sm:$0xff]  }
 0x384   :  { %853 = vmatpush1.bf16.msra.mxu1 %v2302_v6 }
 0x385   :  { %2110 = vmatprep.subr.bf16.mxu1 %v2509_v1 }
 0x432   :  { %v493_v51 = vpop.f32.mrb[12].mxu1 }
 0x433   :  { %v2062_v52 = vpop.f32.mrb[13].mxu1 }
 0x434   :  { %v496_v53 = vpop.f32.mrb[14].mxu1 }
 0x435   :  { %v2063_v54 = vpop.f32.mrb[15].mxu1 }
 0x43a   :  { %v539_v55 = vpop.f32.mrb[16].mxu1 }
 0x43b   :  { %v545_v57 = vpack.c.bf16 %v539_v55, %v493_v51  ;;  %v2068_v58 = vpop.f32.mrb[17].mxu1 }
 0x43c   :  { %v542_v59 = vpop.f32.mrb[18].mxu1 }
 0x43d   :  { %v2069_v60 = vpop.f32.mrb[19].mxu1  ;;  %2087 = vmatmul.mubr.bf16.vlgmr.msra.gmra.mrb[4].mxu0 %v545_v57 }
 0x43e   :  { %2091 = vmatpush3.bf16.msra.mxu0 %v2277_v56  ;;  %2106 = vmatprep.mubr.msk.bf16.mxu0 %vm2510_vm0, %v2509_v1 }
 0x43f   :  { %2092 = vmatprep.subr.bf16.mxu0 %v2509_v1 }
 0x442   :  { %2093 = vmatpush3.bf16.msra.mxu0 %v2281_v61 }
 0x443   :  { %2094 = vmatprep.subr.bf16.mxu0 %v2509_v1 }
 0x446   :  { %2095 = vmatpush3.bf16.msra.mxu0 %v2285_v62 }
 0x447   :  { %2096 = vmatprep.subr.bf16.mxu0 %v2509_v1 }
 0x44a   :  { %2097 = vmatpush3.bf16.msra.mxu0 %v2289_v63  ;;  %v2306_v63 = vld [vmem:[#allocation8 + $0x40] sm:$0xff]  }
 0x44b   :  { %2098 = vmatprep.subr.bf16.mxu0 %v2509_v1 }
 0x44e   :  { %2099 = vmatpush3.bf16.msra.mxu0 %v2293_v2  ;;  %v2307_v2 = vld [vmem:[#allocation8 + $0x48] sm:$0xff]  }
 0x44f   :  { %2100 = vmatprep.subr.bf16.mxu0 %v2509_v1 }
 0x452   :  { %2101 = vmatpush3.bf16.msra.mxu0 %v2297_v3  ;;  %v2308_v3 = vld [vmem:[#allocation8 + $0x50] sm:$0xff]  }
 0x453   :  { %2102 = vmatprep.subr.bf16.mxu0 %v2509_v1 }
 0x456   :  { %2103 = vmatpush3.bf16.msra.mxu0 %v2301_v4  ;;  %v2309_v4 = vld [vmem:[#allocation8 + $0x58] sm:$0xff]  }
 0x457   :  { %2104 = vmatprep.subr.bf16.mxu0 %v2509_v1 }
 0x45a   :  { %2105 = vmatpush3.bf16.msra.mxu0 %v2305_v7 }
 0x45b   :  { %2134 = vmatprep.subr.bf16.mxu0 %v2509_v1 }
 0x510   :  { %v651_v9 = vpop.f32.mrb[4].mxu0 }
 0x511   :  { %v2088_v10 = vpop.f32.mrb[5].mxu0  ;;  %v652_v12 = vadd.f32 %v1867_v8, %v651_v9 }
 0x512   :  { %v654_v11 = vpop.f32.mrb[6].mxu0 }
 0x513   :  { %v655_v13 = vadd.f32 %v1867_v8, %v654_v11  ;;  %v2089_v14 = vpop.f32.mrb[7].mxu0 }
 0x515   :  { %v658_v15 = vpack.c.bf16 %v655_v13, %v652_v12 }
 0x517   :  { %871 = vmatmul.mubr.bf16.vlgmr.msra.gmra.mrb[20].mxu1 %v658_v15  ;;  %2107 = vmatmul.mubr.bf16.vlgmr.msra.gmra.mrb[8].mxu0 %v658_v15 }
 0x518   :  { %2112 = vmatprep.mubr.msk.bf16.mxu1 %vm2510_vm0, %v2509_v1  ;;  %2150 = vmatprep.mubr.msk.bf16.mxu0 %vm2510_vm0, %v2509_v1 }
 0x519   :  { %2135 = vmatpush3.bf16.msra.mxu0 %v2306_v63 }
 0x51a   :  { %2136 = vmatprep.subr.bf16.mxu0 %v2509_v1 }
 0x51d   :  { %2137 = vmatpush3.bf16.msra.mxu0 %v2307_v2 }
 0x51e   :  { %2138 = vmatprep.subr.bf16.mxu0 %v2509_v1 }
 0x521   :  { %2139 = vmatpush3.bf16.msra.mxu0 %v2308_v3 }
 0x522   :  { %2140 = vmatprep.subr.bf16.mxu0 %v2509_v1 }
 0x525   :  { %2141 = vmatpush3.bf16.msra.mxu0 %v2309_v4 }
 0x526   :  { %2142 = vmatprep.subr.bf16.mxu0 %v2509_v1 }
 0x529   :  { %2143 = vmatpush3.bf16.msra.mxu0 %v2310_v5 }
 0x52a   :  { %2144 = vmatprep.subr.bf16.mxu0 %v2509_v1 }
 0x52d   :  { %2145 = vmatpush3.bf16.msra.mxu0 %v2311_v16 }
 0x52e   :  { %2146 = vmatprep.subr.bf16.mxu0 %v2509_v1 }
 0x5ea   :  { %v872_v18 = vpop.f32.mrb[20].mxu1  ;;  %v915_v19 = vpop.f32.mrb[8].mxu0 }
 0x5eb   :  { %v874_v21 = vpop.f32.mrb[21].mxu1  ;;  %v2108_v22 = vpop.f32.mrb[9].mxu0  ;;  %v873_v32 = vadd.f32 %v872_v18, %v698_v26  ;;  %v916_v37 = vadd.f32 %v915_v19, %v706_v20  ;;  %v2313_v18 = vld [vmem:[#allocation8 + $0x78] sm:$0xff]  }
 0x5ec   :  { %v875_v23 = vadd.f32 %v874_v21, %v702_v17  ;;  %v876_v24 = vpop.f32.mrb[22].mxu1  ;;  %v918_v25 = vpop.f32.mrb[10].mxu0  ;;  %v2314_v19 = vld [vmem:[#allocation5 + $0x180] ss:$12 sps:$4 sm:$0xff]   ;;  %v2320_v21 = vld [vmem:[#allocation5 + $0x19c] ss:$12 sps:$4 sm:$0xff]  }
 0x5ed   :  { %v2666_v27 = vadd.f32 %v918_v25, %v706_v20  ;;  %v878_v28 = vpop.f32.mrb[23].mxu1  ;;  %v2109_v29 = vpop.f32.mrb[11].mxu0  ;;  %v922_v35 = vpack.c.bf16 %v873_v32, %v873_v32  ;;  %v877_v38 = vadd.f32 %v876_v24, %v698_v26  ;;  %v1030_v39 = vpack.c.bf16 %v916_v37, %v916_v37  ;;  %v2316_v20 = vld [vmem:[#allocation5 + $0x184] ss:$12 sps:$4 sm:$0xff]   ;;  %v2328_v24 = vld [vmem:[#allocation5 + $0x1cc] ss:$12 sps:$4 sm:$0xff]  }
 0x5ee   :  { %v924_v30 = vpack.c.bf16 %v875_v23, %v875_v23  ;;  %v879_v33 = vadd.f32 %v878_v28, %v702_v17  ;;  %v2312_v17 = vld [vmem:[#allocation8 + $0x70] sm:$0xff]   ;;  %v2326_v25 = vld [vmem:[#allocation5 + $0x1c8] ss:$12 sps:$4 sm:$0xff]   ;;  %v2332_v26 = vld [vmem:[#allocation5 + $0x1e4] ss:$12 sps:$4 sm:$0xff]  }
 0x5ef   :  { %v923_v40 = vpack.c.bf16 %v877_v38, %v877_v38  ;;  %v1036_v41 = vsel %vm455_vm1, %v1030_v39, 0  ;;  %v1031_v9 = vpack.c.bf16 %v2666_v27, %v2666_v27  ;;  %2147 = vmatpush3.bf16.msra.mxu0 %v2312_v17  ;;  %v2318_v22 = vld [vmem:[#allocation5 + $0x198] ss:$12 sps:$4 sm:$0xff]   ;;  %v2322_v23 = vld [vmem:[#allocation5 + $0x1b0] ss:$12 sps:$4 sm:$0xff]  }
 0x5f0   :  { %2111 = vmatpush3.bf16.xpose.msra.mxu1 %v924_v30  ;;  %v925_v36 = vpack.c.bf16 %v879_v33, %v879_v33  ;;  %2148 = vmatprep.subr.bf16.mxu0 %v2509_v1  ;;  %v2330_v27 = vld [vmem:[#allocation5 + $0x1e0] ss:$12 sps:$4 sm:$0xff]   ;;  %v2336_v28 = vld [vmem:[#allocation5 + $0x1fc] ss:$12 sps:$4 sm:$0xff]   ;;  %v2334_v29 = vld [vmem:[#allocation5 + $0x1f8] ss:$12 sps:$4 sm:$0xff]  }
 0x5f1   :  { %2116 = vmatprep.subr.bf16.mxu1 %v2509_v1  ;;  %v1082_v12 = vsel %vm455_vm1, %v1031_v9, 0  ;;  %v2340_v30 = vld [vmem:[#allocation5 + $0x214] ss:$12 sps:$4 sm:$0xff]   ;;  %v2338_v32 = vld [vmem:[#allocation5 + $0x210] ss:$12 sps:$4 sm:$0xff]  }
 0x5f2   :  { %v2317_v39 = vld [vmem:[#allocation5 + $0x188] ss:$12 sps:$4 sm:$0xff]  }
 0x5f3   :  { %2149 = vmatpush3.bf16.msra.mxu0 %v2313_v18 }
 0x5f4   :  { %2154 = vmatprep.subr.bf16.mxu0 %v2509_v1 }
 0x5f7   :  { %2113 = vmatmul.mubr.bf16.vlgmr.msra.gmra.mrb[24].mxu1 %v922_v35 }
 0x5f8   :  { %2117 = vmatpush3.bf16.xpose.msra.mxu1 %v925_v36  ;;  %2118 = vmatprep.mubr.msk.bf16.mxu1 %vm2510_vm0, %v2509_v1 }
 0x5f9   :  { %2122 = vmatprep.subr.bf16.mxu1 %v2509_v1 }
 0x5ff   :  { %2119 = vmatmul.mubr.bf16.vlgmr.msra.gmra.mrb[28].mxu1 %v923_v40 }
 0x600   :  { %2123 = vmatpush3.bf16.msra.mxu1 %v1036_v41  ;;  %2124 = vmatprep.mubr.msk.bf16.mxu1 %vm2510_vm0, %v2509_v1 }
 0x601   :  { %2128 = vmatprep.subr.bf16.mxu1 %v2509_v1 }
 0x6ca   :  { %v960_v42 = vpop.f32.mrb[24].mxu1 }
 0x6cb   :  { %v2114_v43 = vpop.f32.mrb[25].mxu1  ;;  %v1006_v44 = vsel %vm425_vm2, %v960_v42, -inf }
 0x6cc   :  { %1007 = vmax.xlane.f32.xlu0 %v1006_v44  ;;  %v963_v45 = vpop.f32.mrb[26].mxu1  ;;  %v2321_v44 = vld [vmem:[#allocation5 + $0x1a0] ss:$12 sps:$4 sm:$0xff]  }
 0x6cd   :  { %v2115_v46 = vpop.f32.mrb[27].mxu1  ;;  %v2325_v45 = vld [vmem:[#allocation5 + $0x1b8] ss:$12 sps:$4 sm:$0xff]  }
 0x6ce   :  { %v2329_v46 = vld [vmem:[#allocation5 + $0x1d0] ss:$12 sps:$4 sm:$0xff]  }
 0x6d2   :  { %v1000_v47 = vpop.f32.mrb[28].mxu1 }
 0x6d3   :  { %v2120_v49 = vpop.f32.mrb[29].mxu1  ;;  %v1009_v50 = vsel %vm425_vm2, %v1000_v47, -inf }
 0x6d4   :  { %1010 = vmax.xlane.f32.xlu1 %v1009_v50  ;;  %v1003_v51 = vpop.f32.mrb[30].mxu1  ;;  %v2337_v49 = vld [vmem:[#allocation5 + $0x200] ss:$12 sps:$4 sm:$0xff]   ;;  %v2341_v50 = vld [vmem:[#allocation5 + $0x218] ss:$12 sps:$4 sm:$0xff]  }
 0x6d5   :  { %v2121_v52 = vpop.f32.mrb[31].mxu1  ;;  %v2344_v51 = vld [vmem:[#allocation5 + $0x22c] ss:$12 sps:$4 sm:$0xff]  }
 0x6d6   :  { %v2342_v52 = vld [vmem:[#allocation5 + $0x228] ss:$12 sps:$4 sm:$0xff]  }
 0x759   :  { %v1008_v53 = vpop.xlane.xlu0 %1007 }
 0x75a   :  { %v1012_v54 = vsub.f32 %v960_v42, %v1008_v53  ;;  %v2345_v53 = vld [vmem:[#allocation5 + $0x230] ss:$12 sps:$4 sm:$0xff]  }
 0x75c   :  { %v1014_v55 = vmul.f32 1.442695, %v1012_v54  ;;  %v1903_v54 = vld [vmem:[%s2767_s4 + $0x1] ss:$0 sm:$0xff] }
 0x75e   :  { %2362 = vpow2.f32 %v1014_v55 }
 0x761   :  { %v1011_v56 = vpop.xlane.xlu1 %1010 }
 0x762   :  { %v1013_v57 = vsub.f32 %v1000_v47, %v1011_v56  ;;  %v2333_v47 = vld [vmem:[#allocation5 + $0x1e8] ss:$12 sps:$4 sm:$0xff]  }
 0x764   :  { %v1016_v58 = vmul.f32 1.442695, %v1013_v57 }
 0x766   :  { %2364 = vpow2.f32 %v1016_v58 }
 0x768   :  { %v2363_v59 = vpop.eup %2362 }
 0x769   :  { %v1018_v60 = vsel %vm425_vm2, %v2363_v59, 0.0 }
 0x76a   :  { %1019 = vadd.xlane.f32.xlu0 %v1018_v60 }
 0x770   :  { %v2365_v61 = vpop.eup %2364 }
 0x771   :  { %v1021_v62 = vsel %vm425_vm2, %v2365_v61, 0.0 }
 0x772   :  { %1022 = vadd.xlane.f32.xlu1 %v1021_v62  ;;  %v1274_v62 = vld [vmem:[#allocation7 + $0x6] sm:$0x7] }
 0x773   :  { %v1283_v63 = vrot.slane %v1274_v62, %v2610_v31  ;;  %v1287_v4 = vrot.slane %v1274_v62, %v2622_v48 }
 0x7f7   :  { %v1020_v6 = vpop.xlane.xlu0 %1019 }
 0x7f8   :  { %2366 = vrcp.f32 %v1020_v6 }
 0x7ff   :  { %v1023_v7 = vpop.xlane.xlu1 %1022 }
 0x800   :  { %2368 = vrcp.f32 %v1023_v7 }
 0x802   :  { %v2367_v8 = vpop.eup %2366 }
 0x803   :  { %v1025_v10 = vmul.f32 %v2367_v8, %v2363_v59 }
 0x805   :  { %v1028_v11 = vpack.c.bf16 %v1025_v10, %v1025_v10  ;;  %v1279_v10 = vrot.slane %v1274_v62, %v2613_v34 }
 0x807   :  { %2125 = vmatmul.mubr.msk.bf16.vlgmr.msra.gmra.mrb[32].mxu1 %vm425_vm2, %v1028_v11 }
 0x808   :  { %2129 = vmatpush3.bf16.msra.mxu1 %v1082_v12  ;;  %2130 = vmatprep.mubr.msk.bf16.mxu1 %vm2510_vm0, %v2509_v1 }
 0x809   :  { %1419 = vmatprep.subr.bf16.mxu1 %v2316_v20 }
 0x80a   :  { %v2369_v13 = vpop.eup %2368 }
 0x80b   :  { %v1027_v14 = vmul.f32 %v2369_v13, %v2365_v61 }
 0x80d   :  { %v1029_v15 = vpack.c.bf16 %v1027_v14, %v1027_v14 }
 0x80f   :  { %2131 = vmatmul.mubr.msk.bf16.vlgmr.msra.gmra.mrb[36].mxu1 %vm425_vm2, %v1029_v15 }
 0x810   :  { %1451 = vmatprep.mubr.bf16.mxu1 %v2508_v0  ;;  %1420 = vmatpush1.bf16.msra.mxu1 %v2314_v19  ;;  %v2324_v0 = vld [vmem:[#allocation5 + $0x1b4] ss:$12 sps:$4 sm:$0xff]  }
 0x811   :  { %1421 = vmatprep.subr.bf16.mxu1 %v2320_v21 }
 0x814   :  { %1422 = vmatpush1.bf16.msra.mxu1 %v2318_v22 }
 0x815   :  { %1423 = vmatprep.subr.bf16.mxu1 %v2324_v0 }
 0x818   :  { %1424 = vmatpush1.bf16.msra.mxu1 %v2322_v23 }
 0x819   :  { %1425 = vmatprep.subr.bf16.mxu1 %v2328_v24 }
 0x81c   :  { %1426 = vmatpush1.bf16.msra.mxu1 %v2326_v25 }
 0x81d   :  { %1427 = vmatprep.subr.bf16.mxu1 %v2332_v26 }
 0x820   :  { %1428 = vmatpush1.bf16.msra.mxu1 %v2330_v27 }
 0x821   :  { %1429 = vmatprep.subr.bf16.mxu1 %v2336_v28 }
 0x824   :  { %1430 = vmatpush1.bf16.msra.mxu1 %v2334_v29 }
 0x825   :  { %1431 = vmatprep.subr.bf16.mxu1 %v2340_v30 }
 0x828   :  { %1432 = vmatpush1.bf16.msra.mxu1 %v2338_v32 }
 0x829   :  { %1433 = vmatprep.subr.bf16.mxu1 %v2344_v51 }
 0x82c   :  { %1434 = vmatpush1.bf16.msra.mxu1 %v2342_v52 }
 0x82d   :  { %2174 = vmatprep.subr.bf16.mxu1 %v2509_v1 }
 0x8da   :  { %v1072_v33 = vpop.f32.mrb[32].mxu1 }
 0x8db   :  { %v2126_v35 = vpop.f32.mrb[33].mxu1 }
 0x8dc   :  { %v1075_v36 = vpop.f32.mrb[34].mxu1 }
 0x8dd   :  { %v2127_v37 = vpop.f32.mrb[35].mxu1 }
 0x8e2   :  { %v1118_v38 = vpop.f32.mrb[36].mxu1 }
 0x8e3   :  { %v1124_v40 = vpack.c.bf16 %v1118_v38, %v1072_v33  ;;  %v2132_v41 = vpop.f32.mrb[37].mxu1 }
 0x8e4   :  { %v1121_v42 = vpop.f32.mrb[38].mxu1 }
 0x8e5   :  { %v2133_v43 = vpop.f32.mrb[39].mxu1  ;;  %2151 = vmatmul.mubr.bf16.vlgmr.msra.gmra.mrb[12].mxu0 %v1124_v40  ;;  %v2346_v42 = vld [vmem:[#allocation8 + $0x80] sm:$0xff]  }
 0x8e6   :  { %2155 = vmatpush3.bf16.msra.mxu0 %v2317_v39  ;;  %2170 = vmatprep.mubr.msk.bf16.mxu0 %vm2510_vm0, %v2509_v1  ;;  %v2347_v43 = vld [vmem:[#allocation8 + $0x88] sm:$0xff]  }
 0x8e7   :  { %2156 = vmatprep.subr.bf16.mxu0 %v2509_v1 }
 0x8ea   :  { %2157 = vmatpush3.bf16.msra.mxu0 %v2321_v44  ;;  %v2348_v44 = vld [vmem:[#allocation8 + $0x90] sm:$0xff]  }
 0x8eb   :  { %2158 = vmatprep.subr.bf16.mxu0 %v2509_v1 }
 0x8ee   :  { %2159 = vmatpush3.bf16.msra.mxu0 %v2325_v45  ;;  %v2349_v45 = vld [vmem:[#allocation8 + $0x98] sm:$0xff]  }
 0x8ef   :  { %2160 = vmatprep.subr.bf16.mxu0 %v2509_v1 }
 0x8f2   :  { %2161 = vmatpush3.bf16.msra.mxu0 %v2329_v46  ;;  %v2350_v46 = vld [vmem:[#allocation8 + $0xa0] sm:$0xff]  }
 0x8f3   :  { %2162 = vmatprep.subr.bf16.mxu0 %v2509_v1 }
 0x8f6   :  { %2163 = vmatpush3.bf16.msra.mxu0 %v2333_v47 }
 0x8f7   :  { %2164 = vmatprep.subr.bf16.mxu0 %v2509_v1 }
 0x8fa   :  { %2165 = vmatpush3.bf16.msra.mxu0 %v2337_v49 }
 0x8fb   :  { %2166 = vmatprep.subr.bf16.mxu0 %v2509_v1 }
 0x8fe   :  { %2167 = vmatpush3.bf16.msra.mxu0 %v2341_v50 }
 0x8ff   :  { %2168 = vmatprep.subr.bf16.mxu0 %v2509_v1 }
 0x902   :  { %2169 = vmatpush3.bf16.msra.mxu0 %v2345_v53 }
 0x903   :  { %2198 = vmatprep.subr.bf16.mxu0 %v2509_v1 }
 0x9b8   :  { %v1232_v55 = vpop.f32.mrb[12].mxu0 }
 0x9b9   :  { %v2152_v56 = vpop.f32.mrb[13].mxu0  ;;  %v1233_v58 = vadd.f32 %v1903_v54, %v1232_v55 }
 0x9ba   :  { %v1235_v57 = vpop.f32.mrb[14].mxu0 }
 0x9bb   :  { %v1236_v59 = vadd.f32 %v1903_v54, %v1235_v57  ;;  %v2153_v60 = vpop.f32.mrb[15].mxu0 }
 0x9bc   :  { %v2353_v60 = vld [vmem:[#allocation8 + $0xb8] sm:$0xff]  }
 0x9bd   :  { %v1239_v61 = vpack.c.bf16 %v1236_v59, %v1233_v58  ;;  %v2351_v58 = vld [vmem:[#allocation8 + $0xa8] sm:$0xff]   ;;  %v2352_v59 = vld [vmem:[#allocation8 + $0xb0] sm:$0xff]  }
 0x9bf   :  { %1452 = vmatmul.mubr.bf16.vlgmr.msra.gmra.mrb[40].mxu1 %v1239_v61  ;;  %2171 = vmatmul.mubr.bf16.vlgmr.msra.gmra.mrb[16].mxu0 %v1239_v61 }
 0x9c0   :  { %2176 = vmatprep.mubr.msk.bf16.mxu1 %vm2510_vm0, %v2509_v1  ;;  %2214 = vmatprep.mubr.msk.bf16.mxu0 %vm2510_vm0, %v2509_v1 }
 0x9c1   :  { %2199 = vmatpush3.bf16.msra.mxu0 %v2346_v42 }
 0x9c2   :  { %2200 = vmatprep.subr.bf16.mxu0 %v2509_v1 }
 0x9c5   :  { %2201 = vmatpush3.bf16.msra.mxu0 %v2347_v43 }
 0x9c6   :  { %2202 = vmatprep.subr.bf16.mxu0 %v2509_v1 }
 0x9c9   :  { %2203 = vmatpush3.bf16.msra.mxu0 %v2348_v44 }
 0x9ca   :  { %2204 = vmatprep.subr.bf16.mxu0 %v2509_v1 }
 0x9cd   :  { %2205 = vmatpush3.bf16.msra.mxu0 %v2349_v45 }
 0x9ce   :  { %2206 = vmatprep.subr.bf16.mxu0 %v2509_v1 }
 0x9d1   :  { %2207 = vmatpush3.bf16.msra.mxu0 %v2350_v46 }
 0x9d2   :  { %2208 = vmatprep.subr.bf16.mxu0 %v2509_v1 }
 0x9d5   :  { %2209 = vmatpush3.bf16.msra.mxu0 %v2351_v58 }
 0x9d6   :  { %2210 = vmatprep.subr.bf16.mxu0 %v2509_v1 }
 0x9d9   :  { %2211 = vmatpush3.bf16.msra.mxu0 %v2352_v59 }
 0x9da   :  { %2212 = vmatprep.subr.bf16.mxu0 %v2509_v1 }
 0x9dd   :  { %2213 = vmatpush3.bf16.msra.mxu0 %v2353_v60 }
 0xa92   :  { %v1453_v2 = vpop.f32.mrb[40].mxu1  ;;  %v1496_v3 = vpop.f32.mrb[16].mxu0 }
 0xa93   :  { %v1455_v5 = vpop.f32.mrb[41].mxu1  ;;  %v2172_v6 = vpop.f32.mrb[17].mxu0  ;;  %v1454_v15 = vadd.f32 %v1453_v2, %v1279_v10  ;;  %v1497_v48 = vadd.f32 %v1496_v3, %v1287_v4 }
 0xa94   :  { %v1456_v7 = vadd.f32 %v1455_v5, %v1283_v63  ;;  %v1457_v8 = vpop.f32.mrb[42].mxu1  ;;  %v1499_v9 = vpop.f32.mrb[18].mxu0 }
 0xa95   :  { %v2717_v11 = vadd.f32 %v1499_v9, %v1287_v4  ;;  %v1459_v12 = vpop.f32.mrb[43].mxu1  ;;  %v2173_v13 = vpop.f32.mrb[19].mxu0  ;;  %v1503_v16 = vpack.c.bf16 %v1454_v15, %v1454_v15  ;;  %v1458_v18 = vadd.f32 %v1457_v8, %v1279_v10  ;;  %v1611_v34 = vpack.c.bf16 %v1497_v48, %v1497_v48  ;;  %v1939_v8 = vld [vmem:[%s2767_s4 + $0x2] ss:$0 sm:$0xff] }
 0xa96   :  { %v1505_v14 = vpack.c.bf16 %v1456_v7, %v1456_v7  ;;  %v1460_v31 = vadd.f32 %v1459_v12, %v1283_v63 }
 0xa97   :  { %v1504_v19 = vpack.c.bf16 %v1458_v18, %v1458_v18  ;;  %v1617_v20 = vsel %vm455_vm1, %v1611_v34, 0  ;;  %v1612_v51 = vpack.c.bf16 %v2717_v11, %v2717_v11 }
 0xa98   :  { %2175 = vmatpush3.bf16.xpose.msra.mxu1 %v1505_v14  ;;  %v1506_v17 = vpack.c.bf16 %v1460_v31, %v1460_v31 }
 0xa99   :  { %2180 = vmatprep.subr.bf16.mxu1 %v2509_v1  ;;  %v1663_v54 = vsel %vm455_vm1, %v1612_v51, 0 }
 0xa9f   :  { %2177 = vmatmul.mubr.bf16.vlgmr.msra.gmra.mrb[44].mxu1 %v1503_v16 }
 0xaa0   :  { %2181 = vmatpush3.bf16.xpose.msra.mxu1 %v1506_v17  ;;  %2182 = vmatprep.mubr.msk.bf16.mxu1 %vm2510_vm0, %v2509_v1 }
 0xaa1   :  { %2186 = vmatprep.subr.bf16.mxu1 %v2509_v1 }
 0xaa7   :  { %2183 = vmatmul.mubr.bf16.vlgmr.msra.gmra.mrb[48].mxu1 %v1504_v19 }
 0xaa8   :  { %2187 = vmatpush3.bf16.msra.mxu1 %v1617_v20  ;;  %2188 = vmatprep.mubr.msk.bf16.mxu1 %vm2510_vm0, %v2509_v1 }
 0xaa9   :  { %2192 = vmatprep.subr.bf16.mxu1 %v2509_v1 }
 0xb72   :  { %v1541_v21 = vpop.f32.mrb[44].mxu1 }
 0xb73   :  { %v2178_v22 = vpop.f32.mrb[45].mxu1  ;;  %v1587_v0 = vsel %vm425_vm2, %v1541_v21, -inf }
 0xb74   :  { %1588 = vmax.xlane.f32.xlu0 %v1587_v0  ;;  %v1544_v23 = vpop.f32.mrb[46].mxu1 }
 0xb75   :  { %v2179_v24 = vpop.f32.mrb[47].mxu1 }
 0xb7a   :  { %v1581_v25 = vpop.f32.mrb[48].mxu1 }
 0xb7b   :  { %v2184_v26 = vpop.f32.mrb[49].mxu1  ;;  %v1590_v27 = vsel %vm425_vm2, %v1581_v25, -inf }
 0xb7c   :  { %1591 = vmax.xlane.f32.xlu1 %v1590_v27  ;;  %v1584_v28 = vpop.f32.mrb[50].mxu1 }
 0xb7d   :  { %v2185_v29 = vpop.f32.mrb[51].mxu1 }
 0xc01   :  { %v1589_v30 = vpop.xlane.xlu0 %1588 }
 0xc02   :  { %v1593_v32 = vsub.f32 %v1541_v21, %v1589_v30 }
 0xc04   :  { %v1595_v33 = vmul.f32 1.442695, %v1593_v32 }
 0xc06   :  { %2370 = vpow2.f32 %v1595_v33 }
 0xc09   :  { %v1592_v35 = vpop.xlane.xlu1 %1591 }
 0xc0a   :  { %v1594_v36 = vsub.f32 %v1581_v25, %v1592_v35 }
 0xc0c   :  { %v1597_v37 = vmul.f32 1.442695, %v1594_v36 }
 0xc0e   :  { %2372 = vpow2.f32 %v1597_v37 }
 0xc10   :  { %v2371_v38 = vpop.eup %2370 }
 0xc11   :  { %v1599_v39 = vsel %vm425_vm2, %v2371_v38, 0.0 }
 0xc12   :  { %1600 = vadd.xlane.f32.xlu0 %v1599_v39 }
 0xc18   :  { %v2373_v40 = vpop.eup %2372 }
 0xc19   :  { %v1602_v41 = vsel %vm425_vm2, %v2373_v40, 0.0 }
 0xc1a   :  { %1603 = vadd.xlane.f32.xlu1 %v1602_v41 }
 0xc9f   :  { %v1601_v47 = vpop.xlane.xlu0 %1600 }
 0xca0   :  { %2374 = vrcp.f32 %v1601_v47 }
 0xca7   :  { %v1604_v49 = vpop.xlane.xlu1 %1603 }
 0xca8   :  { %2376 = vrcp.f32 %v1604_v49 }
 0xcaa   :  { %v2375_v50 = vpop.eup %2374 }
 0xcab   :  { %v1606_v52 = vmul.f32 %v2375_v50, %v2371_v38 }
 0xcad   :  { %v1609_v53 = vpack.c.bf16 %v1606_v52, %v1606_v52 }
 0xcaf   :  { %2189 = vmatmul.mubr.msk.bf16.vlgmr.msra.gmra.mrb[52].mxu1 %vm425_vm2, %v1609_v53 }
 0xcb0   :  { %2193 = vmatpush3.bf16.msra.mxu1 %v1663_v54  ;;  %2194 = vmatprep.mubr.msk.bf16.mxu1 %vm2510_vm0, %v2509_v1 }
 0xcb2   :  { %v2377_v55 = vpop.eup %2376 }
 0xcb3   :  { %v1608_v56 = vmul.f32 %v2377_v55, %v2373_v40 }
 0xcb5   :  { %v1610_v57 = vpack.c.bf16 %v1608_v56, %v1608_v56 }
 0xcb7   :  { %2195 = vmatmul.mubr.msk.bf16.vlgmr.msra.gmra.mrb[56].mxu1 %vm425_vm2, %v1610_v57 }
 0xd82   :  { %v1653_v61 = vpop.f32.mrb[52].mxu1 }
 0xd83   :  { %v2190_v62 = vpop.f32.mrb[53].mxu1 }
 0xd84   :  { %v1656_v63 = vpop.f32.mrb[54].mxu1 }
 0xd85   :  { %v2191_v2 = vpop.f32.mrb[55].mxu1 }
 0xd8a   :  { %v1699_v3 = vpop.f32.mrb[56].mxu1 }
 0xd8b   :  { %v1705_v4 = vpack.c.bf16 %v1699_v3, %v1653_v61  ;;  %v2196_v5 = vpop.f32.mrb[57].mxu1 }
 0xd8c   :  { %v1702_v6 = vpop.f32.mrb[58].mxu1 }
 0xd8d   :  { %v2197_v7 = vpop.f32.mrb[59].mxu1  ;;  %2215 = vmatmul.mubr.bf16.vlgmr.msra.gmra.mrb[20].mxu0 %v1705_v4 }
 0xe60   :  { %v1813_v9 = vpop.f32.mrb[20].mxu0 }
 0xe61   :  { %v1814_v1 = vadd.f32 %v1939_v8, %v1813_v9  ;;  %v2216_v10 = vpop.f32.mrb[21].mxu0 }
 0xe62   :  { %v1816_v11 = vpop.f32.mrb[22].mxu0 }
 0xe63   :  { %1820 = vst [vmem:[#allocation10] sm:$0xff] %v1814_v1  ;;  %v1817_v12 = vadd.f32 %v1939_v8, %v1816_v11  ;;  %v2217_v13 = vpop.f32.mrb[23].mxu0 }
 0xe65   :  { %1821 = vst [vmem:[#allocation10 + $0x8] sm:$0xff] %v1817_v12 }
 0xe66   :  { %2477 = shalt.err (!%p2474_p8)
}
 0xe67   :  { %s2478_s6 = scalar_lea.hbm %s2768_s5, 256 }
 0xe68   :  { %p2479_p9 = scmp.ne.s32.totalorder %s2768_s5, %s2478_s6  ;;  %p2482_p10 = scmp.lt.u32.totalorder %s2478_s6, %s2768_s5 }
 0xe6a   :  { %p2484_p11 = pnand %p2482_p10, %p2479_p9 }
 0xe6c   :  { %2487 = shalt.err (!%p2484_p11)
}
 0xe6d   :  { %1833 = dma.vmem_to_hbm [thread:$0]  %s1828_s29, 256, %s2768_s5, [#allocation4], %s2500_s1, %s2500_s1, %s2501_s17  }
 0xe6e   :  { %2494 = dma.done.wait [#allocation4], 256  }
 0xe6f   :  { %2495 = vsyncadd [#allocation4], 4294967040 }
 0xe70   :  { %1837 = vsyncpa [#allocation3], 1 }
 0xe71   :  { %1838 = vsyncpa [#allocation6], 1 }
 0xe72   :  { %1839 = vsyncpa [#allocation9], 1 }
 0xe73   :  { %1840 = vsyncpa [#allocation4], 1 }

</bundles_post_ra>
